<compile_context>
chip_gen: v6e
topology: v6e:2x2x1
jax: 0.10.0
libtpu: 0.0.40
codegen_flags: <defaults>
</compile_context>

<pallas_src>
import functools

import jax
import jax.numpy as jnp
from jax.experimental import pallas as pl
from jax.experimental.pallas import tpu as pltpu


def _encoder_kernel(xt_ref, w1t_ref, b1_ref, w2t_ref, b2_ref, o_ref):
    """Fused two-layer MLP; tile columns = particles (lane-dense)."""
    # x tile: (F, TILE_P), bf16 in VMEM -> upcast to f32 so both dots are
    # F32 x F32 = F32 (bf16 only used to halve HBM traffic, not for the MXU).
    x = xt_ref[0].astype(jnp.float32)
    # Layer 1: (H, F) @ (F, TILE_P) -> (H, TILE_P), f32 accumulation.
    h = jnp.dot(w1t_ref[...], x, preferred_element_type=jnp.float32)
    h = jnp.maximum(h + b1_ref[...], 0.0)                      # bias + ReLU
    # Layer 2: (L, H) @ (H, TILE_P) -> (L, TILE_P), f32 accumulation.
    y = jnp.dot(w2t_ref[...], h, preferred_element_type=jnp.float32)
    o_ref[0] = (y + b2_ref[...]).astype(o_ref.dtype)            # lane-dense bf16 store


def particle_encoder_pallas(xt, w1, b1, w2, b2, *, tile_p=8192,
                            out_dtype=jnp.bfloat16):
    """Shared per-particle encoder.

    xt: (B, F, P) bf16 with the particle axis last (lane-dense).
    Returns (B, L, P) in `out_dtype`.
    """
    B, F, P = xt.shape
    H = w1.shape[1]
    L = w2.shape[1]

    # Pad/tiling of the particle (lane) axis.
    p_pad = pl.cdiv(P, 128) * 128
    tile_p = min(tile_p, p_pad)
    if B == 1 and p_pad >= 256:
        # v7x megacore: keep >= 2 grid tiles so both TensorCores get work.
        tile_p = min(tile_p, pl.cdiv(p_pad // 2, 128) * 128)
    p_pad = pl.cdiv(p_pad, tile_p) * tile_p
    if p_pad != P:
        xt = jnp.pad(xt, ((0, 0), (0, 0), (0, p_pad - P)))
    num_p_tiles = p_pad // tile_p

    # Transposed weights so the particle axis stays on lanes through both dots.
    # Kept in f32: tiny, fetched once (constant index maps), resident in VMEM.
    w1t = jnp.transpose(w1).astype(jnp.float32)                  # (H, F)
    w2t = jnp.transpose(w2).astype(jnp.float32)                  # (L, H)
    b1c = b1.reshape(H, 1).astype(jnp.float32)
    b2c = b2.reshape(L, 1).astype(jnp.float32)

    x_itemsize = jnp.dtype(xt.dtype).itemsize
    out_itemsize = jnp.dtype(out_dtype).itemsize
    cost = pl.CostEstimate(
        flops=2 * B * p_pad * (F * H + H * L),
        transcendentals=0,
        bytes_accessed=(B * p_pad * F * x_itemsize                # X read
                        + (H * F + L * H + H + L) * 4             # weights/biases
                        + B * p_pad * L * out_itemsize),          # Y write
    )

    # VMEM budget: double-buffered in/out tiles + resident weights, with
    # headroom; capped well below v7x's 64 MiB physical / 32 MiB scoped VMEM.
    est_vmem = (2 * F * tile_p * x_itemsize
                + 2 * L * tile_p * out_itemsize
                + (H * F + L * H + H + L) * 4)
    vmem_limit = int(min(max(4 * est_vmem, 8 << 20), 24 << 20))

    out = pl.pallas_call(
        _encoder_kernel,
        out_shape=jax.ShapeDtypeStruct((B, L, p_pad), out_dtype),
        grid_spec=pltpu.PrefetchScalarGridSpec(
            num_scalar_prefetch=0,
            grid=(B, num_p_tiles),
            in_specs=[
                pl.BlockSpec((1, F, tile_p), lambda b, j: (b, 0, j)),  # X tile
                pl.BlockSpec((H, F), lambda b, j: (0, 0)),             # W1^T resident
                pl.BlockSpec((H, 1), lambda b, j: (0, 0)),             # b1   resident
                pl.BlockSpec((L, H), lambda b, j: (0, 0)),             # W2^T resident
                pl.BlockSpec((L, 1), lambda b, j: (0, 0)),             # b2   resident
            ],
            out_specs=pl.BlockSpec((1, L, tile_p), lambda b, j: (b, 0, j)),
        ),
        compiler_params=pltpu.CompilerParams(
            # Every (batch, particle-tile) block is independent -> both axes
            # parallel, so Mosaic can shard across v7x's two TensorCores.
            dimension_semantics=("parallel", "parallel"),
            vmem_limit_bytes=vmem_limit,
        ),
        cost_estimate=cost,
    )(xt, w1t, b1c, w2t, b2c)

    # Padded particle columns carry garbage (W2^T.relu(b1)+b2); slice them off.
    return out[:, :, :P] if p_pad != P else out


def _encoder_xla(x3, params, out_dtype=jnp.bfloat16):
    """Vectorized XLA fast path for tiny problems (single-tile territory)."""
    x = x3.astype(jnp.float32)
    h = jnp.maximum(jnp.einsum("bpf,fh->bph", x, params["w1"]) + params["b1"], 0.0)
    y = jnp.einsum("bph,hl->bpl", h, params["w2"]) + params["b2"]
    return jnp.transpose(y, (0, 2, 1)).astype(out_dtype)


@functools.partial(jax.jit, static_argnames=("num_features", "force_pallas"))
def particle_conv_forward(x, params, num_features, force_pallas=False):
    """Mirror of ParticleConv.forward: x (B, P*F) -> (B, L, P) (bf16)."""
    B = x.shape[0]
    P = x.shape[1] // num_features
    F = num_features
    # view(B, -1, F); cast to bf16 BEFORE the minor-dim transpose so the XLA
    # transpose copy moves half the bytes.
    x3 = x.reshape(B, P, F).astype(jnp.bfloat16)

    if not force_pallas and B * (pl.cdiv(P, 128) * 128) <= 2048:
        # Kernel-launch + per-grid-step overhead dwarfs the actual work here.
        return _encoder_xla(x3, params)

    # Present particles on the lane axis: (B, F, P).  The kernel then writes
    # the final (B, L, P) layout directly -> no post-kernel permute.
    xt = jnp.transpose(x3, (0, 2, 1))
    return particle_encoder_pallas(xt, params["w1"], params["b1"],
                                   params["w2"], params["b2"])


def init_encoder_params(key, num_features, hidden, latent):
    k1, k2, k3, k4 = jax.random.split(key, 4)
    w1 = jax.random.normal(k1, (num_features, hidden), jnp.float32) / jnp.sqrt(num_features)
    b1 = jax.random.normal(k2, (hidden,), jnp.float32) * 0.01
    w2 = jax.random.normal(k3, (hidden, latent), jnp.float32) / jnp.sqrt(hidden)
    b2 = jax.random.normal(k4, (latent,), jnp.float32) * 0.01
    return {"w1": w1, "b1": b1, "w2": w2, "b2": b2}


def reference_forward_loop(x, params, num_features):
    """Pure-JAX f32 reference reproducing the PyTorch per-particle loop."""
    B = x.shape[0]
    P = x.shape[1] // num_features
    x3 = x.reshape(B, P, num_features)
    channels = []
    for i in range(P):
        p = x3[:, i, :]
        h = jnp.maximum(p @ params["w1"] + params["b1"], 0.0)
        channels.append(h @ params["w2"] + params["b2"])
    return jnp.stack(channels, 2)


def reference_forward_vec(x, params, num_features):
    """Vectorized f32 reference (identical math, used for the larger shape)."""
    B = x.shape[0]
    P = x.shape[1] // num_features
    x3 = x.reshape(B, P, num_features)
    h = jnp.maximum(jnp.einsum("bpf,fh->bph", x3, params["w1"]) + params["b1"], 0.0)
    y = jnp.einsum("bph,hl->bpl", h, params["w2"]) + params["b2"]
    return jnp.transpose(y, (0, 2, 1))


if __name__ == "__main__":
    key = jax.random.PRNGKey(0)
    kx, kx2, kp = jax.random.split(key, 3)

    B = 2              # batch
    num_features = 4   # F: features per particle
    P = 8              # particles per event
    hidden = 32        # H
    latent = 16        # L

    params = init_encoder_params(kp, num_features, hidden, latent)

    # --- small shape: force the Pallas kernel, check vs the per-particle loop --
    x = jax.random.normal(kx, (B, P * num_features), jnp.float32)
    out = jax.block_until_ready(
        particle_conv_forward(x, params, num_features, force_pallas=True))
    ref = reference_forward_loop(x, params, num_features)
    assert out.shape == (B, latent, P), out.shape
    # bf16 inputs/outputs with f32 accumulation -> loosened tolerance vs f32 ref.
    assert jnp.allclose(out.astype(jnp.float32), ref, atol=5e-2, rtol=5e-2), \
        "mismatch vs reference (small)"

    # --- larger shape: exercises the (batch, particle-tile) grid + padding -----
    B2, P2 = 8, 500    # P padded to 512 -> grid (8, 1), lane-dense 512-wide tiles
    x2 = jax.random.normal(kx2, (B2, P2 * num_features), jnp.float32)
    out2 = jax.block_until_ready(particle_conv_forward(x2, params, num_features))
    ref2 = reference_forward_vec(x2, params, num_features)
    assert out2.shape == (B2, latent, P2), out2.shape
    assert jnp.allclose(out2.astype(jnp.float32), ref2, atol=5e-2, rtol=5e-2), \
        "mismatch vs reference (large)"

    print("KERNEL_OK")
</pallas_src>

<mosaic_0001>
module attributes {stable_mosaic.version = 11 : i64} {
  func.func @_encoder_kernel(%arg0: i32, %arg1: i32, %arg2: memref<1x4x128xbf16, #tpu.memory_space<vmem>>, %arg3: memref<32x4xf32, #tpu.memory_space<vmem>>, %arg4: memref<32x1xf32, #tpu.memory_space<vmem>>, %arg5: memref<16x32xf32, #tpu.memory_space<vmem>>, %arg6: memref<16x1xf32, #tpu.memory_space<vmem>>, %arg7: memref<1x16x128xbf16, #tpu.memory_space<vmem>>) attributes {dimension_semantics = [#tpu.dimension_semantics<parallel>, #tpu.dimension_semantics<parallel>], iteration_bounds = array<i64: 2, 1>, scalar_prefetch = 0 : i64, scratch_operands = 0 : i64, tpu.core_type = #tpu.core_type<tc>, window_params = [{transform_indices = @transform_0, window_bounds = array<i64: 1, 4, 128>}, {pipeline_mode = #tpu.pipeline_mode<synchronous>, transform_indices = @transform_1, window_bounds = array<i64: 32, 4>}, {pipeline_mode = #tpu.pipeline_mode<synchronous>, transform_indices = @transform_2, window_bounds = array<i64: 32, 1>}, {pipeline_mode = #tpu.pipeline_mode<synchronous>, transform_indices = @transform_3, window_bounds = array<i64: 16, 32>}, {pipeline_mode = #tpu.pipeline_mode<synchronous>, transform_indices = @transform_4, window_bounds = array<i64: 16, 1>}, {transform_indices = @transform_5, window_bounds = array<i64: 1, 16, 128>}]} {
    %c0 = arith.constant 0 : index
    %c0_0 = arith.constant 0 : index
    %c0_1 = arith.constant 0 : index
    %0 = vector.load %arg2[%c0, %c0_0, %c0_1] : memref<1x4x128xbf16, #tpu.memory_space<vmem>>, vector<1x4x128xbf16>
    %1 = vector.shape_cast %0 : vector<1x4x128xbf16> to vector<4x128xbf16>
    %2 = arith.extf %1 : vector<4x128xbf16> to vector<4x128xf32>
    %c0_2 = arith.constant 0 : index
    %c0_3 = arith.constant 0 : index
    %3 = vector.load %arg3[%c0_2, %c0_3] : memref<32x4xf32, #tpu.memory_space<vmem>>, vector<32x4xf32>
    %cst = arith.constant dense<0.000000e+00> : vector<32x128xf32>
    %4 = tpu.matmul %3, %2, %cst {dimension_numbers = #tpu.dot_dimension_numbers<[1], [0], [0], [1], [0, 0, 1, 1], [], []>} : vector<32x4xf32>, vector<4x128xf32>, vector<32x128xf32> -> vector<32x128xf32>
    %c0_4 = arith.constant 0 : index
    %c0_5 = arith.constant 0 : index
    %5 = vector.load %arg4[%c0_4, %c0_5] : memref<32x1xf32, #tpu.memory_space<vmem>>, vector<32x1xf32>
    %6 = vector.broadcast %5 : vector<32x1xf32> to vector<32x128xf32>
    %7 = arith.addf %4, %6 : vector<32x128xf32>
    %cst_6 = arith.constant 0.000000e+00 : f32
    %8 = vector.broadcast %cst_6 : f32 to vector<32x128xf32>
    %9 = arith.maximumf %7, %8 : vector<32x128xf32>
    %c0_7 = arith.constant 0 : index
    %c0_8 = arith.constant 0 : index
    %10 = vector.load %arg5[%c0_7, %c0_8] : memref<16x32xf32, #tpu.memory_space<vmem>>, vector<16x32xf32>
    %cst_9 = arith.constant dense<0.000000e+00> : vector<16x128xf32>
    %11 = tpu.matmul %10, %9, %cst_9 {dimension_numbers = #tpu.dot_dimension_numbers<[1], [0], [0], [1], [0, 0, 1, 1], [], []>} : vector<16x32xf32>, vector<32x128xf32>, vector<16x128xf32> -> vector<16x128xf32>
    %c0_10 = arith.constant 0 : index
    %c0_11 = arith.constant 0 : index
    %12 = vector.load %arg6[%c0_10, %c0_11] : memref<16x1xf32, #tpu.memory_space<vmem>>, vector<16x1xf32>
    %13 = vector.broadcast %12 : vector<16x1xf32> to vector<16x128xf32>
    %14 = arith.addf %11, %13 : vector<16x128xf32>
    %15 = arith.truncf %14 : vector<16x128xf32> to vector<16x128xbf16>
    %c0_12 = arith.constant 0 : index
    %c0_13 = arith.constant 0 : index
    %c0_14 = arith.constant 0 : index
    %16 = vector.load %arg7[%c0_12, %c0_13, %c0_14] : memref<1x16x128xbf16, #tpu.memory_space<vmem>>, vector<1x16x128xbf16>
    %17 = vector.shape_cast %16 : vector<1x16x128xbf16> to vector<16x128xbf16>
    %18 = vector.shape_cast %15 : vector<16x128xbf16> to vector<1x16x128xbf16>
    tpu.vector_store %arg7[%c0_12, %c0_13, %c0_14], %18 {strides = array<i32>} : memref<1x16x128xbf16, #tpu.memory_space<vmem>>, vector<1x16x128xbf16>,
    return
  }
  func.func @transform_0(%arg0: i32, %arg1: i32) -> (i32, i32, i32) {
    %c0_i32 = arith.constant 0 : i32
    %c0_i32_0 = arith.constant 0 : i32
    return %arg0, %c0_i32, %arg1 : i32, i32, i32
  }
  func.func @transform_1(%arg0: i32, %arg1: i32) -> (i32, i32) {
    %c0_i32 = arith.constant 0 : i32
    %c0_i32_0 = arith.constant 0 : i32
    %c0_i32_1 = arith.constant 0 : i32
    return %c0_i32, %c0_i32_0 : i32, i32
  }
  func.func @transform_2(%arg0: i32, %arg1: i32) -> (i32, i32) {
    %c0_i32 = arith.constant 0 : i32
    %c0_i32_0 = arith.constant 0 : i32
    %c0_i32_1 = arith.constant 0 : i32
    return %c0_i32, %c0_i32_0 : i32, i32
  }
  func.func @transform_3(%arg0: i32, %arg1: i32) -> (i32, i32) {
    %c0_i32 = arith.constant 0 : i32
    %c0_i32_0 = arith.constant 0 : i32
    %c0_i32_1 = arith.constant 0 : i32
    return %c0_i32, %c0_i32_0 : i32, i32
  }
  func.func @transform_4(%arg0: i32, %arg1: i32) -> (i32, i32) {
    %c0_i32 = arith.constant 0 : i32
    %c0_i32_0 = arith.constant 0 : i32
    %c0_i32_1 = arith.constant 0 : i32
    return %c0_i32, %c0_i32_0 : i32, i32
  }
  func.func @transform_5(%arg0: i32, %arg1: i32) -> (i32, i32, i32) {
    %c0_i32 = arith.constant 0 : i32
    %c0_i32_0 = arith.constant 0 : i32
    return %arg0, %c0_i32, %arg1 : i32, i32, i32
  }
}

</mosaic_0001>

<bundles_post_ra>
// kernel: particle_conv_forward.1
= control target key start
LH: loop header
LB: loop body
LE: loop exit
PB: predicated region body
PF: predicated region fallthrough
CT: control target
= control target key end

     0   :  { %s714_s18 = smov 0   ;;  %s716_s19 = smov 0   ;;  %s793_s0 = inlined_call_operand.vmem [shape: bf16[2,4,128], index: 0, kind: input, shape index: {}]   ;;  %s794_s1 = inlined_call_operand.vmem [shape: f32[32,4], index: 1, kind: input, shape index: {}]   ;;  %s795_s2 = inlined_call_operand.vmem [shape: f32[32,1], index: 2, kind: input, shape index: {}]   ;;  %s796_s3 = inlined_call_operand.vmem [shape: f32[16,32], index: 3, kind: input, shape index: {}]   ;;  %s797_s4 = inlined_call_operand.vmem [shape: f32[16,1], index: 4, kind: input, shape index: {}]   ;;  %s798_s5 = inlined_call_operand.vmem [shape: bf16[2,16,128], index: 5, kind: output, shape index: {}]  }
   0x1   :  { %s718_s20 = smov 0  }
   0x2 LB: > { %s27_s21 = sadd.s32 1, %s677_s19  ;;  %p579_p0 = scmp.ge.s32.totalorder %s681_s20, 1  ;;  %s681_s20 = sphi %s718_s20, %s15_s20   ;;  %s677_s19 = sphi %s716_s19, %s800_s19   ;;  %s673_s18 = sphi %s714_s18, %s799_s18  }
   0x3   : > { %p29_p1 = scmp.ge.s32.totalorder %s27_s21, 2  ;;  %p205_p2 = scmp.lt.s32.totalorder %s681_s20, 3 }
   0x5   : > { %s802_s21 = smov (%p29_p1, %s27_s21), 0  ;;  %p206_p3 = pnand %p579_p0, %p205_p2 }
   0x6   : > { %p238_p4 = scmp.lt.s32.totalorder (!%p206_p3), %s673_s18, 1 }
   0x7   : > { %209 = sbr.rel (%p206_p3) target bundleno = 429 (0x1ad), region = 40 }
   0xc   : > { %v255_v0 = vld [vmem:[%s794_s1] sm:$0xff]  ;;  %vm283_vm0 = vcmask 31744   ;;  %v262_v1 = vld [vmem:[%s795_s2 + $0x18] sm:$0xff]  ;;  %s804_s18 = smov (!%p238_p4, %s673_s18), 1  ;;  %v683_v2 = vmov 0   ;;  %v260_v3 = vld [vmem:[%s795_s2 + $0x8] sm:$0xff] }
   0xd   : > { %615 = vmatprep.mubr.msk.f32.mxu0 %vm283_vm0, %v255_v0  ;;  %657 = vset.pattern.permute.xlu0 %v683_v2  ;;  %s580_s28 = sshll.u32 %s804_s18, 1  ;;  %v261_v4 = vld [vmem:[%s795_s2 + $0x10] sm:$0xff]  ;;  %v259_v5 = vld [vmem:[%s795_s2] sm:$0xff]  ;;  %vm296_vm1 = vcmask 1043456   ;;  %v256_v8 = vld [vmem:[%s794_s1 + $0x8] sm:$0xff]  ;;  %vm403_vm2 = vcmask 261120  }
   0xe   : > { %658 = vset.pattern.permute.xlu1 %v683_v2  ;;  %280 = vperm.xlu0 %657, %v262_v1   ;;  %s244_s10 = scalar_lea.vmem %s793_s0, %s580_s28  ;;  %v391_v9 = vld [vmem:[%s797_s4] sm:$0xff]  ;;  %v257_v10 = vld [vmem:[%s794_s1 + $0x10] sm:$0xff]  ;;  %v392_v11 = vld [vmem:[%s797_s4 + $0x8] sm:$0xff]  ;;  %s594_s29 = sshll.u32 %s804_s18, 3 }
   0xf   : > { %270 = vperm.xlu1 %658, %v260_v3   ;;  %v253_v6 = vld [vmem:[%s244_s10] sm:$0x3]  ;;  %v258_v12 = vld [vmem:[%s794_s1 + $0x18] sm:$0xff]  ;;  %v390_v30 = vld [vmem:[%s796_s3 + $0x8] sm:$0xff]  ;;  %s252_s7 = scalar_lea.vmem %s798_s5, %s594_s29 }
  0x10   : > { %v254_v7 = vunpack.c.l.bf16 %v253_v6  ;;  %v389_v13 = vld [vmem:[%s796_s3] sm:$0xff] }
  0x11   : > { %629 = vmatprep.mubr.msk.f32.mxu1 %vm403_vm2, %v389_v13 }
  0x12   : > { %275 = vperm.xlu0 %657, %v261_v4   ;;  %613 = vmatprep.subr.msk.mxu0 %vm296_vm1, %v254_v7 }
  0x13   : > { %265 = vperm.xlu1 %658, %v259_v5   ;;  %614 = vmatpush3.msk.msra.mxu0 %vm296_vm1, %v254_v7 }
  0x14   : > { %616 = vmatmul.mubr.msk.f32.vlgmr.msra.gmra.mxu0 %vm283_vm0, %v256_v8 }
  0x15   : > { %618 = vmatprep.mubr.msk.f32.mxu0 %vm283_vm0, %v257_v10 }
  0x16   : > { %395 = vperm.xlu0 %657, %v391_v9  }
  0x17   : > { %400 = vperm.xlu1 %658, %v392_v11  }
  0x18   : > { %619 = vmatmul.mubr.msk.f32.gmra.mxu0 %vm283_vm0, %v258_v12 }
  0x89   : > { %v281_v14 = vpop.permute.xlu0 %280 }
  0x8a   : > { %v271_v15 = vpop.permute.xlu1 %270 }
  0x8d   : > { %v276_v19 = vpop.permute.xlu0 %275 }
  0x8e   : > { %v266_v21 = vpop.permute.xlu1 %265 }
  0x91   : > { %v396_v32 = vpop.permute.xlu0 %395 }
  0x92   : > { %v401_v33 = vpop.permute.xlu1 %400 }
  0xd4   : > { %v617_v16 = vpop.f32.mrf.mxu0 }
  0xd5   : > { %v372_v23 = vadd.f32 %v617_v16, %v271_v15 }
  0xd6   : > { %v366_v17 = vpop.f32.mrf.mxu0 }
  0xd7   : > { %v367_v26 = vadd.f32 %v366_v17, %v266_v21  ;;  %v386_v28 = vmax.f32 %v372_v23, 0.0 }
  0xd8   : > { %v620_v18 = vpop.f32.mrf.mxu0 }
  0xd9   : > { %v382_v20 = vadd.f32 %v620_v18, %v281_v14  ;;  %v385_v29 = vmax.f32 %v367_v26, 0.0 }
  0xda   : > { %v376_v22 = vpop.f32.mrf.mxu0 }
  0xdb   : > { %v388_v24 = vmax.f32 %v382_v20, 0.0  ;;  %v377_v25 = vadd.f32 %v376_v22, %v276_v19 }
  0xdd   : > { %v387_v27 = vmax.f32 %v377_v25, 0.0  ;;  %621 = vmatprep.subr.mxu1 %v388_v24 }
  0xde   : > { %622 = vmatpush3.msra.mxu1 %v388_v24 }
  0xdf   : > { %623 = vmatprep.subr.mxu1 %v387_v27 }
  0xe0   : > { %624 = vmatpush3.msra.mxu1 %v387_v27 }
  0xe1   : > { %625 = vmatprep.subr.mxu1 %v386_v28 }
  0xe2   : > { %626 = vmatpush3.msra.mxu1 %v386_v28 }
  0xe3   : > { %627 = vmatprep.subr.mxu1 %v385_v29 }
  0xe4   : > { %628 = vmatpush3.msra.mxu1 %v385_v29 }
  0xe5   : > { %630 = vmatmul.mubr.msk.f32.vlgmr.msra.gmra.mxu1 %vm403_vm2, %v390_v30 }
 0x1a5   : > { %v631_v31 = vpop.f32.mrf.mxu1 }
 0x1a6   : > { %v482_v35 = vadd.f32 %v631_v31, %v401_v33 }
 0x1a7   : > { %v476_v34 = vpop.f32.mrf.mxu1 }
 0x1a8   : > { %v477_v36 = vadd.f32 %v476_v34, %v396_v32 }
 0x1aa   : > { %v600_v37 = vpack.c.bf16 %v482_v35, %v477_v36 }
 0x1ac   : > { %601 = vst [vmem:[%s252_s7] sm:$0xff] %v600_v37  }
 0x1ad PF: > { %s15_s20 = sadd.s32 1, %s681_s20   ;;  %s799_s18 = smov %s677_s19 }
 0x1ae   : > { %p12_p5 = scmp.ge.s32.totalorder %s15_s20, 4   ;;  %s800_s19 = smov %s802_s21 }
 0x1b0   :  { %14 = sbr.rel (!%p12_p5) target bundleno = 2 (0x2), region = 70 }

</bundles_post_ra>
